<compile_context>
chip_gen: v7x
topology: tpu7x:2x2x1
jax: 0.10.0
libtpu: 0.0.40
codegen_flags: <defaults>
</compile_context>

<pallas_src>
import jax
import jax.numpy as jnp
from jax.experimental import pallas as pl
from jax.experimental.pallas import tpu as pltpu

# ----------------------------- problem sizes --------------------------------
BATCH = 2
SEQ = 8
N_INPUT = 4
N_HIDDEN = 32   # n_hidden
N_LAYERS = 1    # PyTorch module uses a single-layer LSTM
N_GATES = 4     # i, f, o, g (note: reordered from PyTorch's i, f, g, o)


# ------------------------------ Pallas kernel -------------------------------
def encoder_kernel(xp_ref, hc0_ref, whh_ref, wv_ref, bv_ref, out_ref):
    """LSTM recurrence over the full sequence + Linear + tanh, all in VMEM.

    xp_ref : (SEQ, BATCH, 4*H)  precomputed x_t @ Wih_fused + (b_ih + b_hh),
                                time-major, gate order (i, f, o, g)
    hc0_ref: (2, BATCH, H)      stacked initial hidden / cell state
    whh_ref: (H, 4*H)           fused hidden->gate weights (i, f, o, g)
    wv_ref : (H, H)             V.weight^T  (so h @ wv == V(h))
    bv_ref : (1, H)             V.bias
    out_ref: (BATCH, H)         tanh(V(h_T))
    """
    H = out_ref.shape[1]
    seq_len = xp_ref.shape[0]

    h = hc0_ref[0]                 # (BATCH, H)  float32
    c = hc0_ref[1]                 # (BATCH, H)  float32
    whh = whh_ref[...]             # hoist the fused weight load out of the loop

    # Static unroll over the (small, static) sequence length.
    for t in range(seq_len):
        # One fused (BATCH, H) @ (H, 4H) MXU dot per step; input projection and
        # biases were already folded into xp.
        gates = xp_ref[t] + jnp.dot(h, whh, preferred_element_type=jnp.float32)

        # Gate layout (i | f | o | g): sigmoid the contiguous (B, 3H) slice,
        # tanh the trailing (B, H) slice.
        sig = jax.nn.sigmoid(gates[:, : 3 * H])
        i = sig[:, :H]
        f = sig[:, H:2 * H]
        o = sig[:, 2 * H:3 * H]
        g = jnp.tanh(gates[:, 3 * H:])

        c = f * c + i * g
        h = o * jnp.tanh(c)

    # c_out = tanh(V(h_T))
    out_ref[...] = jnp.tanh(
        jnp.dot(h, wv_ref[...], preferred_element_type=jnp.float32) + bv_ref[...]
    ).astype(out_ref.dtype)


# ------------------------------ JAX wrapper ----------------------------------
@jax.jit
def encoder_forward(x_bsf, h0, c0, params):
    """x_bsf: (B, S, I) batch_first; h0/c0: (1, B, H). Returns (B, H)."""
    wih_f, whh_f, b_f, wv_t, bv = params
    B, S, _ = x_bsf.shape
    H = whh_f.shape[0]

    # Precompute the input projection + combined bias for ALL timesteps with a
    # single XLA matmul, then lay it out time-major for cheap per-step indexing
    # inside the kernel.  (B, S, I) @ (I, 4H) -> (B, S, 4H) -> (S, B, 4H)
    xp = jnp.dot(x_bsf, wih_f) + b_f
    xp = jnp.swapaxes(xp, 0, 1)

    # Stack h0/c0 into one array to cut the number of sub-tile DMAs.
    hc0 = jnp.stack([h0[0], c0[0]], axis=0)          # (2, B, H)

    vmem = pl.BlockSpec(memory_space=pltpu.MemorySpace.VMEM)
    out = pl.pallas_call(
        encoder_kernel,
        out_shape=jax.ShapeDtypeStruct((B, H), jnp.float32),
        in_specs=[vmem] * 5,
        out_specs=vmem,
    )(xp, hc0, whh_f, wv_t, bv)
    return out


# ------------------------ pure-JAX reference (check) -------------------------
def encoder_reference(x_bsf, h0, c0, params):
    wih_f, whh_f, b_f, wv_t, bv = params
    H = whh_f.shape[0]
    h = h0[0]
    c = c0[0]
    for t in range(x_bsf.shape[1]):
        gates = x_bsf[:, t, :] @ wih_f + b_f + h @ whh_f
        i = jax.nn.sigmoid(gates[:, :H])
        f = jax.nn.sigmoid(gates[:, H:2 * H])
        o = jax.nn.sigmoid(gates[:, 2 * H:3 * H])
        g = jnp.tanh(gates[:, 3 * H:])
        c = f * c + i * g
        h = o * jnp.tanh(c)
    return jnp.tanh(h @ wv_t + bv)


# ------------------------------- parameters ----------------------------------
def init_params(key):
    """Deterministic init mimicking PyTorch's U(-1/sqrt(H), 1/sqrt(H)).

    Weights are built directly in the FUSED layout used by the kernel:
      wih_f : (I, 4H)   columns ordered (i | f | o | g)
      whh_f : (H, 4H)   columns ordered (i | f | o | g)
      b_f   : (1, 4H)   b_ih + b_hh, same ordering
    To load real PyTorch LSTM weights, transpose W_ih/W_hh (PyTorch stores
    (4H, in)) and permute gate blocks from (i, f, g, o) to (i, f, o, g).
    """
    bound = 1.0 / jnp.sqrt(jnp.float32(N_HIDDEN))
    ks = jax.random.split(key, 6)
    wih_f = jax.random.uniform(ks[0], (N_INPUT, N_GATES * N_HIDDEN),
                               jnp.float32, -bound, bound)
    whh_f = jax.random.uniform(ks[1], (N_HIDDEN, N_GATES * N_HIDDEN),
                               jnp.float32, -bound, bound)
    b_ih = jax.random.uniform(ks[2], (1, N_GATES * N_HIDDEN),
                              jnp.float32, -bound, bound)
    b_hh = jax.random.uniform(ks[3], (1, N_GATES * N_HIDDEN),
                              jnp.float32, -bound, bound)
    b_f = b_ih + b_hh                                   # LSTM adds both biases
    wv_t = jax.random.uniform(ks[4], (N_HIDDEN, N_HIDDEN),
                              jnp.float32, -bound, bound)
    bv = jax.random.uniform(ks[5], (1, N_HIDDEN), jnp.float32, -bound, bound)
    return (wih_f, whh_f, b_f, wv_t, bv)


if __name__ == "__main__":
    key = jax.random.PRNGKey(0)
    k_x, k_h, k_c, k_p = jax.random.split(key, 4)

    x = jax.random.normal(k_x, (BATCH, SEQ, N_INPUT), jnp.float32)        # batch_first
    h0 = jax.random.normal(k_h, (N_LAYERS, BATCH, N_HIDDEN), jnp.float32)
    c0 = jax.random.normal(k_c, (N_LAYERS, BATCH, N_HIDDEN), jnp.float32)
    params = init_params(k_p)

    out = encoder_forward(x, h0, c0, params)
    out = jax.block_until_ready(out)

    ref = encoder_reference(x, h0, c0, params)
    assert out.shape == (BATCH, N_HIDDEN)
    assert jnp.allclose(out, ref, atol=1e-5, rtol=1e-5), "kernel mismatch vs reference"

    print("KERNEL_OK")
</pallas_src>

<mosaic_0001>
module attributes {stable_mosaic.version = 11 : i64} {
  func.func @encoder_kernel(%arg0: memref<8x2x128xf32, #tpu.memory_space<vmem>>, %arg1: memref<2x2x32xf32, #tpu.memory_space<vmem>>, %arg2: memref<32x128xf32, #tpu.memory_space<vmem>>, %arg3: memref<32x32xf32, #tpu.memory_space<vmem>>, %arg4: memref<1x32xf32, #tpu.memory_space<vmem>>, %arg5: memref<2x32xf32, #tpu.memory_space<vmem>>) attributes {dimension_semantics = [], scalar_prefetch = 0 : i64, scratch_operands = 0 : i64, tpu.core_type = #tpu.core_type<tc>} {
    %c0 = arith.constant 0 : index
    %c0_0 = arith.constant 0 : index
    %c0_1 = arith.constant 0 : index
    %0 = vector.load %arg1[%c0, %c0_0, %c0_1] : memref<2x2x32xf32, #tpu.memory_space<vmem>>, vector<1x2x32xf32>
    %1 = vector.shape_cast %0 : vector<1x2x32xf32> to vector<2x32xf32>
    %c1 = arith.constant 1 : index
    %c0_2 = arith.constant 0 : index
    %c0_3 = arith.constant 0 : index
    %2 = vector.load %arg1[%c1, %c0_2, %c0_3] : memref<2x2x32xf32, #tpu.memory_space<vmem>>, vector<1x2x32xf32>
    %3 = vector.shape_cast %2 : vector<1x2x32xf32> to vector<2x32xf32>
    %c0_4 = arith.constant 0 : index
    %c0_5 = arith.constant 0 : index
    %4 = vector.load %arg2[%c0_4, %c0_5] : memref<32x128xf32, #tpu.memory_space<vmem>>, vector<32x128xf32>
    %c0_6 = arith.constant 0 : index
    %c0_7 = arith.constant 0 : index
    %c0_8 = arith.constant 0 : index
    %5 = vector.load %arg0[%c0_6, %c0_7, %c0_8] : memref<8x2x128xf32, #tpu.memory_space<vmem>>, vector<1x2x128xf32>
    %6 = vector.shape_cast %5 : vector<1x2x128xf32> to vector<2x128xf32>
    %cst = arith.constant dense<0.000000e+00> : vector<2x128xf32>
    %7 = tpu.matmul %1, %4, %cst {dimension_numbers = #tpu.dot_dimension_numbers<[1], [0], [0], [1], [0, 0, 1, 1], [], []>} : vector<2x32xf32>, vector<32x128xf32>, vector<2x128xf32> -> vector<2x128xf32>
    %8 = arith.addf %6, %7 : vector<2x128xf32>
    %9 = vector.extract_strided_slice %8 {offsets = [0, 0], sizes = [2, 96], strides = [1, 1]} : vector<2x128xf32> to vector<2x96xf32>
    %10 = arith.negf %9 : vector<2x96xf32>
    %11 = math.exp %10 : vector<2x96xf32>
    %cst_9 = arith.constant 1.000000e+00 : f32
    %12 = vector.broadcast %cst_9 : f32 to vector<2x96xf32>
    %13 = arith.addf %12, %11 : vector<2x96xf32>
    %14 = arith.divf %12, %13 : vector<2x96xf32>
    %15 = vector.extract_strided_slice %14 {offsets = [0, 0], sizes = [2, 32], strides = [1, 1]} : vector<2x96xf32> to vector<2x32xf32>
    %16 = vector.extract_strided_slice %14 {offsets = [0, 32], sizes = [2, 32], strides = [1, 1]} : vector<2x96xf32> to vector<2x32xf32>
    %17 = vector.extract_strided_slice %14 {offsets = [0, 64], sizes = [2, 32], strides = [1, 1]} : vector<2x96xf32> to vector<2x32xf32>
    %18 = vector.extract_strided_slice %8 {offsets = [0, 96], sizes = [2, 32], strides = [1, 1]} : vector<2x128xf32> to vector<2x32xf32>
    %19 = math.tanh %18 : vector<2x32xf32>
    %20 = arith.mulf %16, %3 : vector<2x32xf32>
    %21 = arith.mulf %15, %19 : vector<2x32xf32>
    %22 = arith.addf %20, %21 : vector<2x32xf32>
    %23 = math.tanh %22 : vector<2x32xf32>
    %24 = arith.mulf %17, %23 : vector<2x32xf32>
    %c1_10 = arith.constant 1 : index
    %c0_11 = arith.constant 0 : index
    %c0_12 = arith.constant 0 : index
    %25 = vector.load %arg0[%c1_10, %c0_11, %c0_12] : memref<8x2x128xf32, #tpu.memory_space<vmem>>, vector<1x2x128xf32>
    %26 = vector.shape_cast %25 : vector<1x2x128xf32> to vector<2x128xf32>
    %cst_13 = arith.constant dense<0.000000e+00> : vector<2x128xf32>
    %27 = tpu.matmul %24, %4, %cst_13 {dimension_numbers = #tpu.dot_dimension_numbers<[1], [0], [0], [1], [0, 0, 1, 1], [], []>} : vector<2x32xf32>, vector<32x128xf32>, vector<2x128xf32> -> vector<2x128xf32>
    %28 = arith.addf %26, %27 : vector<2x128xf32>
    %29 = vector.extract_strided_slice %28 {offsets = [0, 0], sizes = [2, 96], strides = [1, 1]} : vector<2x128xf32> to vector<2x96xf32>
    %30 = arith.negf %29 : vector<2x96xf32>
    %31 = math.exp %30 : vector<2x96xf32>
    %cst_14 = arith.constant 1.000000e+00 : f32
    %32 = vector.broadcast %cst_14 : f32 to vector<2x96xf32>
    %33 = arith.addf %32, %31 : vector<2x96xf32>
    %34 = arith.divf %32, %33 : vector<2x96xf32>
    %35 = vector.extract_strided_slice %34 {offsets = [0, 0], sizes = [2, 32], strides = [1, 1]} : vector<2x96xf32> to vector<2x32xf32>
    %36 = vector.extract_strided_slice %34 {offsets = [0, 32], sizes = [2, 32], strides = [1, 1]} : vector<2x96xf32> to vector<2x32xf32>
    %37 = vector.extract_strided_slice %34 {offsets = [0, 64], sizes = [2, 32], strides = [1, 1]} : vector<2x96xf32> to vector<2x32xf32>
    %38 = vector.extract_strided_slice %28 {offsets = [0, 96], sizes = [2, 32], strides = [1, 1]} : vector<2x128xf32> to vector<2x32xf32>
    %39 = math.tanh %38 : vector<2x32xf32>
    %40 = arith.mulf %36, %22 : vector<2x32xf32>
    %41 = arith.mulf %35, %39 : vector<2x32xf32>
    %42 = arith.addf %40, %41 : vector<2x32xf32>
    %43 = math.tanh %42 : vector<2x32xf32>
    %44 = arith.mulf %37, %43 : vector<2x32xf32>
    %c2 = arith.constant 2 : index
    %c0_15 = arith.constant 0 : index
    %c0_16 = arith.constant 0 : index
    %45 = vector.load %arg0[%c2, %c0_15, %c0_16] : memref<8x2x128xf32, #tpu.memory_space<vmem>>, vector<1x2x128xf32>
    %46 = vector.shape_cast %45 : vector<1x2x128xf32> to vector<2x128xf32>
    %cst_17 = arith.constant dense<0.000000e+00> : vector<2x128xf32>
    %47 = tpu.matmul %44, %4, %cst_17 {dimension_numbers = #tpu.dot_dimension_numbers<[1], [0], [0], [1], [0, 0, 1, 1], [], []>} : vector<2x32xf32>, vector<32x128xf32>, vector<2x128xf32> -> vector<2x128xf32>
    %48 = arith.addf %46, %47 : vector<2x128xf32>
    %49 = vector.extract_strided_slice %48 {offsets = [0, 0], sizes = [2, 96], strides = [1, 1]} : vector<2x128xf32> to vector<2x96xf32>
    %50 = arith.negf %49 : vector<2x96xf32>
    %51 = math.exp %50 : vector<2x96xf32>
    %cst_18 = arith.constant 1.000000e+00 : f32
    %52 = vector.broadcast %cst_18 : f32 to vector<2x96xf32>
    %53 = arith.addf %52, %51 : vector<2x96xf32>
    %54 = arith.divf %52, %53 : vector<2x96xf32>
    %55 = vector.extract_strided_slice %54 {offsets = [0, 0], sizes = [2, 32], strides = [1, 1]} : vector<2x96xf32> to vector<2x32xf32>
    %56 = vector.extract_strided_slice %54 {offsets = [0, 32], sizes = [2, 32], strides = [1, 1]} : vector<2x96xf32> to vector<2x32xf32>
    %57 = vector.extract_strided_slice %54 {offsets = [0, 64], sizes = [2, 32], strides = [1, 1]} : vector<2x96xf32> to vector<2x32xf32>
    %58 = vector.extract_strided_slice %48 {offsets = [0, 96], sizes = [2, 32], strides = [1, 1]} : vector<2x128xf32> to vector<2x32xf32>
    %59 = math.tanh %58 : vector<2x32xf32>
    %60 = arith.mulf %56, %42 : vector<2x32xf32>
    %61 = arith.mulf %55, %59 : vector<2x32xf32>
    %62 = arith.addf %60, %61 : vector<2x32xf32>
    %63 = math.tanh %62 : vector<2x32xf32>
    %64 = arith.mulf %57, %63 : vector<2x32xf32>
    %c3 = arith.constant 3 : index
    %c0_19 = arith.constant 0 : index
    %c0_20 = arith.constant 0 : index
    %65 = vector.load %arg0[%c3, %c0_19, %c0_20] : memref<8x2x128xf32, #tpu.memory_space<vmem>>, vector<1x2x128xf32>
    %66 = vector.shape_cast %65 : vector<1x2x128xf32> to vector<2x128xf32>
    %cst_21 = arith.constant dense<0.000000e+00> : vector<2x128xf32>
    %67 = tpu.matmul %64, %4, %cst_21 {dimension_numbers = #tpu.dot_dimension_numbers<[1], [0], [0], [1], [0, 0, 1, 1], [], []>} : vector<2x32xf32>, vector<32x128xf32>, vector<2x128xf32> -> vector<2x128xf32>
    %68 = arith.addf %66, %67 : vector<2x128xf32>
    %69 = vector.extract_strided_slice %68 {offsets = [0, 0], sizes = [2, 96], strides = [1, 1]} : vector<2x128xf32> to vector<2x96xf32>
    %70 = arith.negf %69 : vector<2x96xf32>
    %71 = math.exp %70 : vector<2x96xf32>
    %cst_22 = arith.constant 1.000000e+00 : f32
    %72 = vector.broadcast %cst_22 : f32 to vector<2x96xf32>
    %73 = arith.addf %72, %71 : vector<2x96xf32>
    %74 = arith.divf %72, %73 : vector<2x96xf32>
    %75 = vector.extract_strided_slice %74 {offsets = [0, 0], sizes = [2, 32], strides = [1, 1]} : vector<2x96xf32> to vector<2x32xf32>
    %76 = vector.extract_strided_slice %74 {offsets = [0, 32], sizes = [2, 32], strides = [1, 1]} : vector<2x96xf32> to vector<2x32xf32>
    %77 = vector.extract_strided_slice %74 {offsets = [0, 64], sizes = [2, 32], strides = [1, 1]} : vector<2x96xf32> to vector<2x32xf32>
    %78 = vector.extract_strided_slice %68 {offsets = [0, 96], sizes = [2, 32], strides = [1, 1]} : vector<2x128xf32> to vector<2x32xf32>
    %79 = math.tanh %78 : vector<2x32xf32>
    %80 = arith.mulf %76, %62 : vector<2x32xf32>
    %81 = arith.mulf %75, %79 : vector<2x32xf32>
    %82 = arith.addf %80, %81 : vector<2x32xf32>
    %83 = math.tanh %82 : vector<2x32xf32>
    %84 = arith.mulf %77, %83 : vector<2x32xf32>
    %c4 = arith.constant 4 : index
    %c0_23 = arith.constant 0 : index
    %c0_24 = arith.constant 0 : index
    %85 = vector.load %arg0[%c4, %c0_23, %c0_24] : memref<8x2x128xf32, #tpu.memory_space<vmem>>, vector<1x2x128xf32>
    %86 = vector.shape_cast %85 : vector<1x2x128xf32> to vector<2x128xf32>
    %cst_25 = arith.constant dense<0.000000e+00> : vector<2x128xf32>
    %87 = tpu.matmul %84, %4, %cst_25 {dimension_numbers = #tpu.dot_dimension_numbers<[1], [0], [0], [1], [0, 0, 1, 1], [], []>} : vector<2x32xf32>, vector<32x128xf32>, vector<2x128xf32> -> vector<2x128xf32>
    %88 = arith.addf %86, %87 : vector<2x128xf32>
    %89 = vector.extract_strided_slice %88 {offsets = [0, 0], sizes = [2, 96], strides = [1, 1]} : vector<2x128xf32> to vector<2x96xf32>
    %90 = arith.negf %89 : vector<2x96xf32>
    %91 = math.exp %90 : vector<2x96xf32>
    %cst_26 = arith.constant 1.000000e+00 : f32
    %92 = vector.broadcast %cst_26 : f32 to vector<2x96xf32>
    %93 = arith.addf %92, %91 : vector<2x96xf32>
    %94 = arith.divf %92, %93 : vector<2x96xf32>
    %95 = vector.extract_strided_slice %94 {offsets = [0, 0], sizes = [2, 32], strides = [1, 1]} : vector<2x96xf32> to vector<2x32xf32>
    %96 = vector.extract_strided_slice %94 {offsets = [0, 32], sizes = [2, 32], strides = [1, 1]} : vector<2x96xf32> to vector<2x32xf32>
    %97 = vector.extract_strided_slice %94 {offsets = [0, 64], sizes = [2, 32], strides = [1, 1]} : vector<2x96xf32> to vector<2x32xf32>
    %98 = vector.extract_strided_slice %88 {offsets = [0, 96], sizes = [2, 32], strides = [1, 1]} : vector<2x128xf32> to vector<2x32xf32>
    %99 = math.tanh %98 : vector<2x32xf32>
    %100 = arith.mulf %96, %82 : vector<2x32xf32>
    %101 = arith.mulf %95, %99 : vector<2x32xf32>
    %102 = arith.addf %100, %101 : vector<2x32xf32>
    %103 = math.tanh %102 : vector<2x32xf32>
    %104 = arith.mulf %97, %103 : vector<2x32xf32>
    %c5 = arith.constant 5 : index
    %c0_27 = arith.constant 0 : index
    %c0_28 = arith.constant 0 : index
    %105 = vector.load %arg0[%c5, %c0_27, %c0_28] : memref<8x2x128xf32, #tpu.memory_space<vmem>>, vector<1x2x128xf32>
    %106 = vector.shape_cast %105 : vector<1x2x128xf32> to vector<2x128xf32>
    %cst_29 = arith.constant dense<0.000000e+00> : vector<2x128xf32>
    %107 = tpu.matmul %104, %4, %cst_29 {dimension_numbers = #tpu.dot_dimension_numbers<[1], [0], [0], [1], [0, 0, 1, 1], [], []>} : vector<2x32xf32>, vector<32x128xf32>, vector<2x128xf32> -> vector<2x128xf32>
    %108 = arith.addf %106, %107 : vector<2x128xf32>
    %109 = vector.extract_strided_slice %108 {offsets = [0, 0], sizes = [2, 96], strides = [1, 1]} : vector<2x128xf32> to vector<2x96xf32>
    %110 = arith.negf %109 : vector<2x96xf32>
    %111 = math.exp %110 : vector<2x96xf32>
    %cst_30 = arith.constant 1.000000e+00 : f32
    %112 = vector.broadcast %cst_30 : f32 to vector<2x96xf32>
    %113 = arith.addf %112, %111 : vector<2x96xf32>
    %114 = arith.divf %112, %113 : vector<2x96xf32>
    %115 = vector.extract_strided_slice %114 {offsets = [0, 0], sizes = [2, 32], strides = [1, 1]} : vector<2x96xf32> to vector<2x32xf32>
    %116 = vector.extract_strided_slice %114 {offsets = [0, 32], sizes = [2, 32], strides = [1, 1]} : vector<2x96xf32> to vector<2x32xf32>
    %117 = vector.extract_strided_slice %114 {offsets = [0, 64], sizes = [2, 32], strides = [1, 1]} : vector<2x96xf32> to vector<2x32xf32>
    %118 = vector.extract_strided_slice %108 {offsets = [0, 96], sizes = [2, 32], strides = [1, 1]} : vector<2x128xf32> to vector<2x32xf32>
    %119 = math.tanh %118 : vector<2x32xf32>
    %120 = arith.mulf %116, %102 : vector<2x32xf32>
    %121 = arith.mulf %115, %119 : vector<2x32xf32>
    %122 = arith.addf %120, %121 : vector<2x32xf32>
    %123 = math.tanh %122 : vector<2x32xf32>
    %124 = arith.mulf %117, %123 : vector<2x32xf32>
    %c6 = arith.constant 6 : index
    %c0_31 = arith.constant 0 : index
    %c0_32 = arith.constant 0 : index
    %125 = vector.load %arg0[%c6, %c0_31, %c0_32] : memref<8x2x128xf32, #tpu.memory_space<vmem>>, vector<1x2x128xf32>
    %126 = vector.shape_cast %125 : vector<1x2x128xf32> to vector<2x128xf32>
    %cst_33 = arith.constant dense<0.000000e+00> : vector<2x128xf32>
    %127 = tpu.matmul %124, %4, %cst_33 {dimension_numbers = #tpu.dot_dimension_numbers<[1], [0], [0], [1], [0, 0, 1, 1], [], []>} : vector<2x32xf32>, vector<32x128xf32>, vector<2x128xf32> -> vector<2x128xf32>
    %128 = arith.addf %126, %127 : vector<2x128xf32>
    %129 = vector.extract_strided_slice %128 {offsets = [0, 0], sizes = [2, 96], strides = [1, 1]} : vector<2x128xf32> to vector<2x96xf32>
    %130 = arith.negf %129 : vector<2x96xf32>
    %131 = math.exp %130 : vector<2x96xf32>
    %cst_34 = arith.constant 1.000000e+00 : f32
    %132 = vector.broadcast %cst_34 : f32 to vector<2x96xf32>
    %133 = arith.addf %132, %131 : vector<2x96xf32>
    %134 = arith.divf %132, %133 : vector<2x96xf32>
    %135 = vector.extract_strided_slice %134 {offsets = [0, 0], sizes = [2, 32], strides = [1, 1]} : vector<2x96xf32> to vector<2x32xf32>
    %136 = vector.extract_strided_slice %134 {offsets = [0, 32], sizes = [2, 32], strides = [1, 1]} : vector<2x96xf32> to vector<2x32xf32>
    %137 = vector.extract_strided_slice %134 {offsets = [0, 64], sizes = [2, 32], strides = [1, 1]} : vector<2x96xf32> to vector<2x32xf32>
    %138 = vector.extract_strided_slice %128 {offsets = [0, 96], sizes = [2, 32], strides = [1, 1]} : vector<2x128xf32> to vector<2x32xf32>
    %139 = math.tanh %138 : vector<2x32xf32>
    %140 = arith.mulf %136, %122 : vector<2x32xf32>
    %141 = arith.mulf %135, %139 : vector<2x32xf32>
    %142 = arith.addf %140, %141 : vector<2x32xf32>
    %143 = math.tanh %142 : vector<2x32xf32>
    %144 = arith.mulf %137, %143 : vector<2x32xf32>
    %c7 = arith.constant 7 : index
    %c0_35 = arith.constant 0 : index
    %c0_36 = arith.constant 0 : index
    %145 = vector.load %arg0[%c7, %c0_35, %c0_36] : memref<8x2x128xf32, #tpu.memory_space<vmem>>, vector<1x2x128xf32>
    %146 = vector.shape_cast %145 : vector<1x2x128xf32> to vector<2x128xf32>
    %cst_37 = arith.constant dense<0.000000e+00> : vector<2x128xf32>
    %147 = tpu.matmul %144, %4, %cst_37 {dimension_numbers = #tpu.dot_dimension_numbers<[1], [0], [0], [1], [0, 0, 1, 1], [], []>} : vector<2x32xf32>, vector<32x128xf32>, vector<2x128xf32> -> vector<2x128xf32>
    %148 = arith.addf %146, %147 : vector<2x128xf32>
    %149 = vector.extract_strided_slice %148 {offsets = [0, 0], sizes = [2, 96], strides = [1, 1]} : vector<2x128xf32> to vector<2x96xf32>
    %150 = arith.negf %149 : vector<2x96xf32>
    %151 = math.exp %150 : vector<2x96xf32>
    %cst_38 = arith.constant 1.000000e+00 : f32
    %152 = vector.broadcast %cst_38 : f32 to vector<2x96xf32>
    %153 = arith.addf %152, %151 : vector<2x96xf32>
    %154 = arith.divf %152, %153 : vector<2x96xf32>
    %155 = vector.extract_strided_slice %154 {offsets = [0, 0], sizes = [2, 32], strides = [1, 1]} : vector<2x96xf32> to vector<2x32xf32>
    %156 = vector.extract_strided_slice %154 {offsets = [0, 32], sizes = [2, 32], strides = [1, 1]} : vector<2x96xf32> to vector<2x32xf32>
    %157 = vector.extract_strided_slice %154 {offsets = [0, 64], sizes = [2, 32], strides = [1, 1]} : vector<2x96xf32> to vector<2x32xf32>
    %158 = vector.extract_strided_slice %148 {offsets = [0, 96], sizes = [2, 32], strides = [1, 1]} : vector<2x128xf32> to vector<2x32xf32>
    %159 = math.tanh %158 : vector<2x32xf32>
    %160 = arith.mulf %156, %142 : vector<2x32xf32>
    %161 = arith.mulf %155, %159 : vector<2x32xf32>
    %162 = arith.addf %160, %161 : vector<2x32xf32>
    %163 = math.tanh %162 : vector<2x32xf32>
    %164 = arith.mulf %157, %163 : vector<2x32xf32>
    %c0_39 = arith.constant 0 : index
    %c0_40 = arith.constant 0 : index
    %165 = vector.load %arg3[%c0_39, %c0_40] : memref<32x32xf32, #tpu.memory_space<vmem>>, vector<32x32xf32>
    %cst_41 = arith.constant dense<0.000000e+00> : vector<2x32xf32>
    %166 = tpu.matmul %164, %165, %cst_41 {dimension_numbers = #tpu.dot_dimension_numbers<[1], [0], [0], [1], [0, 0, 1, 1], [], []>} : vector<2x32xf32>, vector<32x32xf32>, vector<2x32xf32> -> vector<2x32xf32>
    %c0_42 = arith.constant 0 : index
    %c0_43 = arith.constant 0 : index
    %167 = vector.load %arg4[%c0_42, %c0_43] : memref<1x32xf32, #tpu.memory_space<vmem>>, vector<1x32xf32>
    %168 = vector.broadcast %167 : vector<1x32xf32> to vector<2x32xf32>
    %169 = arith.addf %166, %168 : vector<2x32xf32>
    %170 = math.tanh %169 : vector<2x32xf32>
    %c0_44 = arith.constant 0 : index
    %c0_45 = arith.constant 0 : index
    %171 = vector.load %arg5[%c0_44, %c0_45] : memref<2x32xf32, #tpu.memory_space<vmem>>, vector<2x32xf32>
    tpu.vector_store %arg5[%c0_44, %c0_45], %170 {strides = array<i32>} : memref<2x32xf32, #tpu.memory_space<vmem>>, vector<2x32xf32>,
    return
  }
}

</mosaic_0001>

<bundles_post_ra>
// kernel: encoder_forward.1
= control target key start
LH: loop header
LB: loop body
LE: loop exit
PB: predicated region body
PF: predicated region fallthrough
CT: control target
= control target key end

     0   :  { %v1269_v3 = vmov 0.0|0.0   ;;  %vm1270_vm0 = vmmov 0   ;;  %v1271_v6 = vmov 0.0   ;;  %s1472_s0 = inlined_call_operand.vmem [shape: f32[8,2,128], index: 0, kind: input, shape index: {}]   ;;  %s1473_s1 = inlined_call_operand.vmem [shape: f32[2,2,32], index: 1, kind: input, shape index: {}]   ;;  %s1474_s2 = inlined_call_operand.vmem [shape: f32[32,128], index: 2, kind: input, shape index: {}]   ;;  %s1475_s3 = inlined_call_operand.vmem [shape: f32[32,32], index: 3, kind: input, shape index: {}]   ;;  %s1476_s4 = inlined_call_operand.vmem [shape: f32[1,32], index: 4, kind: input, shape index: {}]   ;;  %s1477_s5 = inlined_call_operand.hbm [shape: f32[2,32], index: 5, kind: output, shape index: {}]  }
   0x1   :  { %v24_v0 = vld [vmem:[%s1474_s2] sm:$0xff]  ;;  %v25_v1 = vld [vmem:[%s1474_s2 + $0x8] sm:$0xff]  ;;  %v26_v2 = vld [vmem:[%s1474_s2 + $0x10] sm:$0xff]  ;;  %1119 = vmatprep.subr.bf16.mxu0 %v1269_v3  ;;  %1028 = vmatprep.mubr.msk.f32.mxu0 %vm1270_vm0, %v1271_v6 }
   0x2   :  { %v1315_v4 = vpack.c.bf16 %v25_v1, %v24_v0  ;;  %v27_v5 = vld [vmem:[%s1474_s2 + $0x18] sm:$0xff]  ;;  %1125 = vmatprep.subr.bf16.mxu1 %v1269_v3  ;;  %1039 = vmatprep.mubr.msk.f32.mxu1 %vm1270_vm0, %v1271_v6 }
   0x3   :  { %10 = vsyncpa [#allocation3], 0  ;;  %v1326_v7 = vpack.c.bf16 %v27_v5, %v26_v2  ;;  %v21_v8 = vld [vmem:[%s1473_s1] sm:$0x3]  ;;  %vm29_vm1 = vcmask 261120   ;;  %s1272_s29 = smov 32  }
   0x4   :  { %1121 = vmatpush3.bf16.msra.mxu0 %v1315_v4  ;;  %1127 = vmatpush3.bf16.msra.mxu1 %v1315_v4  ;;  %v28_v9 = vld [vmem:[%s1472_s0] sm:$0x3]  ;;  %v949_v14 = vld [vmem:[%s1473_s1 + $0x2] sm:$0x3]  ;;  %s1273_s1 = smov 64   ;;  %vm933_vm2 = vcmask 254976  }
   0x5   :  { %1122 = vmatprep.subr.bf16.mxu0 %v1269_v3  ;;  %1128 = vmatprep.subr.bf16.mxu1 %v1269_v3  ;;  %v952_v29 = vld [vmem:[%s1472_s0 + $0x2] sm:$0x3]  ;;  %v955_v47 = vld [vmem:[%s1472_s0 + $0x4] sm:$0x3]  ;;  %v958_v1 = vld [vmem:[%s1472_s0 + $0x6] sm:$0x3] }
   0x8   :  { %1124 = vmatpush3.bf16.msra.mxu0 %v1326_v7  ;;  %1130 = vmatpush3.bf16.msra.mxu1 %v1326_v7 }
   0x9   :  { %1131 = vmatprep.subr.bf16.mxu0 %v1269_v3  ;;  %1137 = vmatprep.subr.bf16.mxu1 %v1269_v3 }
   0xb   :  { %1029 = vmatmul.mubr.msk.f32.vlgmr.msra.gmra.mrb[0].mxu0 %vm29_vm1, %v21_v8 }
   0xc   :  { %1133 = vmatpush3.bf16.msra.mxu0 %v1315_v4  ;;  %1050 = vmatprep.mubr.msk.f32.mxu0 %vm1270_vm0, %v1271_v6 }
   0xd   :  { %1134 = vmatprep.subr.bf16.mxu0 %v1269_v3 }
  0x10   :  { %1136 = vmatpush3.bf16.msra.mxu0 %v1326_v7 }
  0x11   :  { %1143 = vmatprep.subr.bf16.mxu0 %v1269_v3 }
  0xde   :  { %v99_v10 = vpop.f32.mrb[0].mxu0 }
  0xdf   :  { %v103_v11 = vadd.f32 %v99_v10, %v28_v9  ;;  %v1030_v12 = vpop.f32.mrb[1].mxu0 }
  0xe1   :  { %1179 = vtanh.f32 %v103_v11  ;;  %v951_v15 = vmul.f32 -1.442695, %v103_v11 }
  0xe3   :  { %1181 = vpow2.f32 %v951_v15 }
  0xeb   :  { %v1180_v13 = vpop.eup %1179 }
  0xec   :  { %117 = vrot.lane.b32.xlu0 %v1180_v13, %s1272_s29 }
  0xed   :  { %v1182_v16 = vpop.eup %1181 }
  0xee   :  { %v107_v17 = vadd.f32 1.0, %v1182_v16 }
  0xf0   :  { %112 = vrot.lane.b32.xlu0 %v949_v14, %s1272_s29  ;;  %1183 = vrcp.f32 %v107_v17 }
  0xfa   :  { %v1184_v18 = vpop.eup %1183 }
 0x15e   :  { %v118_v19 = vpop.permute.xlu0 %117 }
 0x15f   :  { %v120_v20 = vmul.f32 %v1184_v18, %v118_v19 }
 0x161   :  { %122 = vrot.lane.b32.xlu1 %v120_v20, %s1272_s29 }
 0x162   :  { %v113_v21 = vpop.permute.xlu0 %112 }
 0x163   :  { %v115_v22 = vmul.f32 %v1184_v18, %v113_v21 }
 0x1d3   :  { %v123_v23 = vpop.permute.xlu1 %122 }
 0x1d4   :  { %v125_v24 = vadd.f32 %v123_v23, %v115_v22  ;;  %v961_v23 = vld [vmem:[%s1472_s0 + $0x8] sm:$0x3] }
 0x1d6   :  { %1185 = vtanh.f32 %v125_v24 }
 0x1e0   :  { %v1186_v25 = vpop.eup %1185 }
 0x1e1   :  { %128 = vrot.lane.b32.xlu1 %v1186_v25, %s1272_s29 }
 0x253   :  { %v129_v26 = vpop.permute.xlu1 %128 }
 0x254   :  { %v131_v27 = vmul.f32 %v1184_v18, %v129_v26 }
 0x256   :  { %135 = vrot.lane.b32.xlu0 %v131_v27, %s1273_s1 }
 0x2c8   :  { %v136_v28 = vpop.permute.xlu0 %135 }
 0x2c9   :  { %1040 = vmatmul.mubr.msk.f32.vlgmr.msra.gmra.mrb[0].mxu1 %vm29_vm1, %v136_v28 }
 0x2ca   :  { %1139 = vmatpush3.bf16.msra.mxu1 %v1315_v4  ;;  %1061 = vmatprep.mubr.msk.f32.mxu1 %vm1270_vm0, %v1271_v6 }
 0x2cb   :  { %1140 = vmatprep.subr.bf16.mxu1 %v1269_v3 }
 0x2ce   :  { %1142 = vmatpush3.bf16.msra.mxu1 %v1326_v7 }
 0x2cf   :  { %1149 = vmatprep.subr.bf16.mxu1 %v1269_v3 }
 0x39c   :  { %v205_v30 = vpop.f32.mrb[0].mxu1 }
 0x39d   :  { %v209_v31 = vadd.f32 %v952_v29, %v205_v30  ;;  %v1041_v32 = vpop.f32.mrb[1].mxu1 }
 0x39f   :  { %1187 = vtanh.f32 %v209_v31  ;;  %v954_v34 = vmul.f32 -1.442695, %v209_v31 }
 0x3a1   :  { %1189 = vpow2.f32 %v954_v34 }
 0x3a9   :  { %v1188_v33 = vpop.eup %1187 }
 0x3aa   :  { %219 = vrot.lane.b32.xlu1 %v1188_v33, %s1272_s29 }
 0x3ab   :  { %v1190_v35 = vpop.eup %1189 }
 0x3ac   :  { %v213_v36 = vadd.f32 1.0, %v1190_v35 }
 0x3ae   :  { %1191 = vrcp.f32 %v213_v36 }
 0x3b8   :  { %v1192_v37 = vpop.eup %1191 }
 0x3b9   :  { %v217_v40 = vmul.f32 %v1192_v37, %v125_v24 }
 0x41c   :  { %v220_v38 = vpop.permute.xlu1 %219 }
 0x41d   :  { %v222_v39 = vmul.f32 %v1192_v37, %v220_v38 }
 0x41f   :  { %224 = vrot.lane.b32.xlu0 %v222_v39, %s1272_s29 }
 0x491   :  { %v225_v41 = vpop.permute.xlu0 %224 }
 0x492   :  { %v227_v42 = vadd.f32 %v225_v41, %v217_v40  ;;  %v964_v41 = vld [vmem:[%s1472_s0 + $0xa] sm:$0x3] }
 0x494   :  { %1193 = vtanh.f32 %v227_v42 }
 0x49e   :  { %v1194_v43 = vpop.eup %1193 }
 0x49f   :  { %230 = vrot.lane.b32.xlu1 %v1194_v43, %s1272_s29 }
 0x511   :  { %v231_v44 = vpop.permute.xlu1 %230 }
 0x512   :  { %v233_v45 = vmul.f32 %v1192_v37, %v231_v44 }
 0x514   :  { %237 = vrot.lane.b32.xlu0 %v233_v45, %s1273_s1 }
 0x586   :  { %v238_v46 = vpop.permute.xlu0 %237 }
 0x587   :  { %1051 = vmatmul.mubr.msk.f32.vlgmr.msra.gmra.mrb[2].mxu0 %vm29_vm1, %v238_v46 }
 0x588   :  { %1145 = vmatpush3.bf16.msra.mxu0 %v1315_v4  ;;  %1072 = vmatprep.mubr.msk.f32.mxu0 %vm1270_vm0, %v1271_v6 }
 0x589   :  { %1146 = vmatprep.subr.bf16.mxu0 %v1269_v3 }
 0x58c   :  { %1148 = vmatpush3.bf16.msra.mxu0 %v1326_v7 }
 0x58d   :  { %1155 = vmatprep.subr.bf16.mxu0 %v1269_v3 }
 0x65a   :  { %v307_v48 = vpop.f32.mrb[2].mxu0 }
 0x65b   :  { %v311_v49 = vadd.f32 %v955_v47, %v307_v48  ;;  %v1052_v50 = vpop.f32.mrb[3].mxu0 }
 0x65d   :  { %1195 = vtanh.f32 %v311_v49  ;;  %v957_v52 = vmul.f32 -1.442695, %v311_v49 }
 0x65f   :  { %1197 = vpow2.f32 %v957_v52 }
 0x667   :  { %v1196_v51 = vpop.eup %1195 }
 0x668   :  { %321 = vrot.lane.b32.xlu1 %v1196_v51, %s1272_s29 }
 0x669   :  { %v1198_v53 = vpop.eup %1197 }
 0x66a   :  { %v315_v54 = vadd.f32 1.0, %v1198_v53 }
 0x66c   :  { %1199 = vrcp.f32 %v315_v54 }
 0x676   :  { %v1200_v55 = vpop.eup %1199 }
 0x677   :  { %v319_v58 = vmul.f32 %v1200_v55, %v227_v42 }
 0x6da   :  { %v322_v56 = vpop.permute.xlu1 %321 }
 0x6db   :  { %v324_v57 = vmul.f32 %v1200_v55, %v322_v56 }
 0x6dd   :  { %326 = vrot.lane.b32.xlu0 %v324_v57, %s1272_s29  ;;  %v967_v57 = vld [vmem:[%s1472_s0 + $0xc] sm:$0x3] }
 0x74f   :  { %v327_v59 = vpop.permute.xlu0 %326 }
 0x750   :  { %v329_v60 = vadd.f32 %v327_v59, %v319_v58 }
 0x752   :  { %1201 = vtanh.f32 %v329_v60 }
 0x75c   :  { %v1202_v61 = vpop.eup %1201 }
 0x75d   :  { %332 = vrot.lane.b32.xlu1 %v1202_v61, %s1272_s29 }
 0x7cf   :  { %v333_v62 = vpop.permute.xlu1 %332 }
 0x7d0   :  { %v335_v63 = vmul.f32 %v1200_v55, %v333_v62 }
 0x7d2   :  { %339 = vrot.lane.b32.xlu0 %v335_v63, %s1273_s1 }
 0x844   :  { %v340_v0 = vpop.permute.xlu0 %339 }
 0x845   :  { %1062 = vmatmul.mubr.msk.f32.vlgmr.msra.gmra.mrb[2].mxu1 %vm29_vm1, %v340_v0 }
 0x846   :  { %1151 = vmatpush3.bf16.msra.mxu1 %v1315_v4  ;;  %1083 = vmatprep.mubr.msk.f32.mxu1 %vm1270_vm0, %v1271_v6 }
 0x847   :  { %1152 = vmatprep.subr.bf16.mxu1 %v1269_v3 }
 0x84a   :  { %1154 = vmatpush3.bf16.msra.mxu1 %v1326_v7 }
 0x84b   :  { %1161 = vmatprep.subr.bf16.mxu1 %v1269_v3 }
 0x918   :  { %v409_v2 = vpop.f32.mrb[2].mxu1 }
 0x919   :  { %v413_v5 = vadd.f32 %v958_v1, %v409_v2  ;;  %v1063_v8 = vpop.f32.mrb[3].mxu1 }
 0x91b   :  { %1203 = vtanh.f32 %v413_v5  ;;  %v960_v10 = vmul.f32 -1.442695, %v413_v5 }
 0x91d   :  { %1205 = vpow2.f32 %v960_v10 }
 0x925   :  { %v1204_v9 = vpop.eup %1203 }
 0x926   :  { %423 = vrot.lane.b32.xlu1 %v1204_v9, %s1272_s29 }
 0x927   :  { %v1206_v11 = vpop.eup %1205 }
 0x928   :  { %v417_v12 = vadd.f32 1.0, %v1206_v11 }
 0x92a   :  { %1207 = vrcp.f32 %v417_v12 }
 0x934   :  { %v1208_v13 = vpop.eup %1207 }
 0x935   :  { %v421_v16 = vmul.f32 %v1208_v13, %v329_v60 }
 0x998   :  { %v424_v14 = vpop.permute.xlu1 %423 }
 0x999   :  { %v426_v15 = vmul.f32 %v1208_v13, %v424_v14  ;;  %v970_v14 = vld [vmem:[%s1472_s0 + $0xe] sm:$0x3] }
 0x99b   :  { %428 = vrot.lane.b32.xlu0 %v426_v15, %s1272_s29 }
 0xa0d   :  { %v429_v17 = vpop.permute.xlu0 %428 }
 0xa0e   :  { %v431_v18 = vadd.f32 %v429_v17, %v421_v16 }
 0xa10   :  { %1209 = vtanh.f32 %v431_v18 }
 0xa1a   :  { %v1210_v19 = vpop.eup %1209 }
 0xa1b   :  { %434 = vrot.lane.b32.xlu1 %v1210_v19, %s1272_s29 }
 0xa8d   :  { %v435_v20 = vpop.permute.xlu1 %434 }
 0xa8e   :  { %v437_v21 = vmul.f32 %v1208_v13, %v435_v20 }
 0xa90   :  { %441 = vrot.lane.b32.xlu0 %v437_v21, %s1273_s1 }
 0xb02   :  { %v442_v22 = vpop.permute.xlu0 %441 }
 0xb03   :  { %1073 = vmatmul.mubr.msk.f32.vlgmr.msra.gmra.mrb[4].mxu0 %vm29_vm1, %v442_v22 }
 0xb04   :  { %1157 = vmatpush3.bf16.msra.mxu0 %v1315_v4  ;;  %1094 = vmatprep.mubr.msk.f32.mxu0 %vm1270_vm0, %v1271_v6 }
 0xb05   :  { %1158 = vmatprep.subr.bf16.mxu0 %v1269_v3 }
 0xb08   :  { %1160 = vmatpush3.bf16.msra.mxu0 %v1326_v7 }
 0xb09   :  { %1167 = vmatprep.subr.bf16.mxu0 %v1269_v3 }
 0xbd6   :  { %v511_v24 = vpop.f32.mrb[4].mxu0 }
 0xbd7   :  { %v515_v25 = vadd.f32 %v961_v23, %v511_v24  ;;  %v1074_v26 = vpop.f32.mrb[5].mxu0 }
 0xbd9   :  { %1211 = vtanh.f32 %v515_v25  ;;  %v963_v28 = vmul.f32 -1.442695, %v515_v25 }
 0xbdb   :  { %1213 = vpow2.f32 %v963_v28  ;;  %v846_v28 = vld [vmem:[%s1475_s3] sm:$0xff] }
 0xbe3   :  { %v1212_v27 = vpop.eup %1211 }
 0xbe4   :  { %525 = vrot.lane.b32.xlu1 %v1212_v27, %s1272_s29 }
 0xbe5   :  { %v1214_v29 = vpop.eup %1213 }
 0xbe6   :  { %v519_v30 = vadd.f32 1.0, %v1214_v29  ;;  %v847_v29 = vld [vmem:[%s1475_s3 + $0x8] sm:$0xff] }
 0xbe8   :  { %1215 = vrcp.f32 %v519_v30  ;;  %v848_v30 = vld [vmem:[%s1475_s3 + $0x10] sm:$0xff] }
 0xbf2   :  { %v1216_v31 = vpop.eup %1215 }
 0xbf3   :  { %v523_v34 = vmul.f32 %v1216_v31, %v431_v18 }
 0xc56   :  { %v526_v32 = vpop.permute.xlu1 %525 }
 0xc57   :  { %v528_v33 = vmul.f32 %v1216_v31, %v526_v32  ;;  %v849_v32 = vld [vmem:[%s1475_s3 + $0x18] sm:$0xff]  ;;  %s1274_s3 = smov [#allocation2]  }
 0xc58   :  { %s941_s30 = sshll.u32 %s1274_s3, 4  ;;  %s942_s30 = int_to_ptr.vmem [resolvable:$true] %s941_s30 }
 0xc59   :  { %530 = vrot.lane.b32.xlu0 %v528_v33, %s1272_s29  ;;  %v1171_v33 = vpack.c.bf16 %v849_v32, %v848_v30  ;;  %p1250_p1 = scmp.lt.s32.totalorder %s942_s30, %s942_s30 }
 0xccb   :  { %v531_v35 = vpop.permute.xlu0 %530 }
 0xccc   :  { %v533_v36 = vadd.f32 %v531_v35, %v523_v34 }
 0xcce   :  { %1217 = vtanh.f32 %v533_v36 }
 0xcd8   :  { %v1218_v37 = vpop.eup %1217 }
 0xcd9   :  { %536 = vrot.lane.b32.xlu1 %v1218_v37, %s1272_s29 }
 0xd4b   :  { %v537_v38 = vpop.permute.xlu1 %536 }
 0xd4c   :  { %v539_v39 = vmul.f32 %v1216_v31, %v537_v38  ;;  %v1168_v31 = vpack.c.bf16 %v847_v29, %v846_v28  ;;  %v973_v38 = vld [vmem:[%s1476_s4] ss:$0 sm:$0xff] }
 0xd4e   :  { %543 = vrot.lane.b32.xlu0 %v539_v39, %s1273_s1 }
 0xdc0   :  { %v544_v40 = vpop.permute.xlu0 %543 }
 0xdc1   :  { %1084 = vmatmul.mubr.msk.f32.vlgmr.msra.gmra.mrb[4].mxu1 %vm29_vm1, %v544_v40 }
 0xdc2   :  { %1163 = vmatpush3.bf16.msra.mxu1 %v1315_v4  ;;  %1105 = vmatprep.mubr.msk.f32.mxu1 %vm1270_vm0, %v1271_v6 }
 0xdc3   :  { %1164 = vmatprep.subr.bf16.mxu1 %v1269_v3 }
 0xdc6   :  { %1166 = vmatpush3.bf16.msra.mxu1 %v1326_v7 }
 0xe94   :  { %v613_v42 = vpop.f32.mrb[4].mxu1 }
 0xe95   :  { %v617_v43 = vadd.f32 %v964_v41, %v613_v42  ;;  %v1085_v44 = vpop.f32.mrb[5].mxu1 }
 0xe97   :  { %1219 = vtanh.f32 %v617_v43  ;;  %v966_v46 = vmul.f32 -1.442695, %v617_v43 }
 0xe99   :  { %1221 = vpow2.f32 %v966_v46 }
 0xea1   :  { %v1220_v45 = vpop.eup %1219 }
 0xea2   :  { %627 = vrot.lane.b32.xlu1 %v1220_v45, %s1272_s29 }
 0xea3   :  { %v1222_v4 = vpop.eup %1221 }
 0xea4   :  { %v621_v47 = vadd.f32 1.0, %v1222_v4 }
 0xea6   :  { %1223 = vrcp.f32 %v621_v47 }
 0xeb0   :  { %v1224_v48 = vpop.eup %1223 }
 0xeb1   :  { %v625_v7 = vmul.f32 %v1224_v48, %v533_v36 }
 0xf14   :  { %v628_v49 = vpop.permute.xlu1 %627 }
 0xf15   :  { %v630_v50 = vmul.f32 %v1224_v48, %v628_v49 }
 0xf17   :  { %632 = vrot.lane.b32.xlu0 %v630_v50, %s1272_s29 }
 0xf89   :  { %v633_v51 = vpop.permute.xlu0 %632 }
 0xf8a   :  { %v635_v52 = vadd.f32 %v633_v51, %v625_v7 }
 0xf8c   :  { %1225 = vtanh.f32 %v635_v52 }
 0xf96   :  { %v1226_v53 = vpop.eup %1225 }
 0xf97   :  { %638 = vrot.lane.b32.xlu1 %v1226_v53, %s1272_s29 }
0x1009   :  { %v639_v54 = vpop.permute.xlu1 %638 }
0x100a   :  { %v641_v55 = vmul.f32 %v1224_v48, %v639_v54 }
0x100c   :  { %645 = vrot.lane.b32.xlu0 %v641_v55, %s1273_s1 }
0x107e   :  { %v646_v56 = vpop.permute.xlu0 %645 }
0x107f   :  { %1095 = vmatmul.mubr.msk.f32.vlgmr.msra.gmra.mrb[6].mxu0 %vm29_vm1, %v646_v56 }
0x1080   :  { %1116 = vmatprep.mubr.msk.f32.mxu0 %vm1270_vm0, %v1271_v6  ;;  %1169 = vmatpush3.bf16.msra.mxu0 %v1168_v31 }
0x1081   :  { %1170 = vmatprep.subr.bf16.mxu0 %v1269_v3 }
0x1084   :  { %1172 = vmatpush3.bf16.msra.mxu0 %v1171_v33 }
0x1152   :  { %v715_v58 = vpop.f32.mrb[6].mxu0 }
0x1153   :  { %v719_v59 = vadd.f32 %v967_v57, %v715_v58  ;;  %v1096_v60 = vpop.f32.mrb[7].mxu0 }
0x1155   :  { %1227 = vtanh.f32 %v719_v59  ;;  %v969_v62 = vmul.f32 -1.442695, %v719_v59 }
0x1157   :  { %1229 = vpow2.f32 %v969_v62 }
0x115f   :  { %v1228_v61 = vpop.eup %1227 }
0x1160   :  { %729 = vrot.lane.b32.xlu1 %v1228_v61, %s1272_s29 }
0x1161   :  { %v1230_v63 = vpop.eup %1229 }
0x1162   :  { %v723_v0 = vadd.f32 1.0, %v1230_v63 }
0x1164   :  { %1231 = vrcp.f32 %v723_v0 }
0x116e   :  { %v1232_v1 = vpop.eup %1231 }
0x116f   :  { %v727_v6 = vmul.f32 %v1232_v1, %v635_v52 }
0x11d2   :  { %v730_v2 = vpop.permute.xlu1 %729 }
0x11d3   :  { %v732_v5 = vmul.f32 %v1232_v1, %v730_v2 }
0x11d5   :  { %734 = vrot.lane.b32.xlu0 %v732_v5, %s1272_s29 }
0x1247   :  { %v735_v8 = vpop.permute.xlu0 %734 }
0x1248   :  { %v737_v9 = vadd.f32 %v735_v8, %v727_v6 }
0x124a   :  { %1233 = vtanh.f32 %v737_v9 }
0x1254   :  { %v1234_v10 = vpop.eup %1233 }
0x1255   :  { %740 = vrot.lane.b32.xlu1 %v1234_v10, %s1272_s29 }
0x12c7   :  { %v741_v11 = vpop.permute.xlu1 %740 }
0x12c8   :  { %v743_v12 = vmul.f32 %v1232_v1, %v741_v11 }
0x12ca   :  { %747 = vrot.lane.b32.xlu0 %v743_v12, %s1273_s1 }
0x133c   :  { %v748_v13 = vpop.permute.xlu0 %747 }
0x133d   :  { %1106 = vmatmul.mubr.msk.f32.vlgmr.msra.gmra.mrb[6].mxu1 %vm29_vm1, %v748_v13 }
0x1410   :  { %v817_v15 = vpop.f32.mrb[6].mxu1 }
0x1411   :  { %v821_v16 = vadd.f32 %v970_v14, %v817_v15  ;;  %v1107_v17 = vpop.f32.mrb[7].mxu1 }
0x1413   :  { %1235 = vtanh.f32 %v821_v16  ;;  %v972_v19 = vmul.f32 -1.442695, %v821_v16 }
0x1415   :  { %1237 = vpow2.f32 %v972_v19 }
0x141d   :  { %v1236_v18 = vpop.eup %1235 }
0x141e   :  { %831 = vrot.lane.b32.xlu1 %v1236_v18, %s1272_s29 }
0x141f   :  { %v1238_v20 = vpop.eup %1237 }
0x1420   :  { %v825_v21 = vadd.f32 1.0, %v1238_v20 }
0x1422   :  { %1239 = vrcp.f32 %v825_v21 }
0x142c   :  { %v1240_v22 = vpop.eup %1239 }
0x142d   :  { %v829_v25 = vmul.f32 %v1240_v22, %v737_v9 }
0x1490   :  { %v832_v23 = vpop.permute.xlu1 %831 }
0x1491   :  { %v834_v24 = vmul.f32 %v1240_v22, %v832_v23 }
0x1493   :  { %836 = vrot.lane.b32.xlu0 %v834_v24, %s1272_s29 }
0x1505   :  { %v837_v26 = vpop.permute.xlu0 %836 }
0x1506   :  { %v839_v27 = vadd.f32 %v837_v26, %v829_v25 }
0x1508   :  { %1241 = vtanh.f32 %v839_v27 }
0x1512   :  { %v1242_v34 = vpop.eup %1241 }
0x1513   :  { %842 = vrot.lane.b32.xlu1 %v1242_v34, %s1272_s29  ;;  %s1245_s29 = scalar_lea.vmem %s942_s30, 32 }
0x1514   :  { %p1246_p0 = scmp.ne.s32.totalorder %s942_s30, %s1245_s29  ;;  %p1251_p2 = scmp.lt.s32.totalorder %s1245_s29, %s1245_s29 }
0x1516   :  { %p1252_p3 = por %p1251_p2, %p1250_p1 }
0x1518   :  { %p1253_p4 = pnand %p1252_p3, %p1246_p0 }
0x1585   :  { %v843_v35 = vpop.permute.xlu1 %842 }
0x1586   :  { %v845_v36 = vmul.f32 %v1240_v22, %v843_v35 }
0x1588   :  { %858 = vrot.lane.b32.xlu0 %v845_v36, %s1273_s1 }
0x15fa   :  { %v859_v37 = vpop.permute.xlu0 %858 }
0x15fb   :  { %1117 = vmatmul.mubr.msk.f32.vlgmr.msra.gmra.mrb[8].mxu0 %vm29_vm1, %v859_v37 }
0x16ce   :  { %v928_v39 = vpop.f32.mrb[8].mxu0 }
0x16cf   :  { %v929_v40 = vadd.f32 %v973_v38, %v928_v39  ;;  %v1118_v41 = vpop.f32.mrb[9].mxu0 }
0x16d1   :  { %1243 = vtanh.f32 %v929_v40 }
0x16db   :  { %v1244_v3 = vpop.eup %1243 }
0x16dc   :  { %934 = vst.msk [vmem:[#allocation2] sm:$0x3] %vm933_vm2, %v1244_v3 }
0x16dd   :  { %1256 = shalt.err (!%p1253_p4)
}
0x16de   :  { %s1257_s4 = scalar_lea.hbm %s1477_s5, 32 }
0x16df   :  { %p1258_p5 = scmp.ne.s32.totalorder %s1477_s5, %s1257_s4  ;;  %p1261_p6 = scmp.lt.u32.totalorder %s1257_s4, %s1477_s5 }
0x16e1   :  { %p1263_p7 = pnand %p1261_p6, %p1258_p5 }
0x16e3   :  { %1266 = shalt.err (!%p1263_p7)
}
0x16e4   :  { %944 = dma.vmem_to_hbm [thread:$0]  %s942_s30, 32, %s1477_s5, [#allocation3]  }
0x16e5   :  { %1267 = dma.done.wait [#allocation3], 32  }
0x16e6   :  { %1268 = vsyncadd [#allocation3], 4294967264 }
0x16e7   :  { %948 = vsyncpa [#allocation3], 1 }

</bundles_post_ra>
